<compile_context>
chip_gen: v5e
topology: v5e:2x2
jax: 0.10.0
libtpu: 0.0.40
codegen_flags: <defaults>
</compile_context>

<pallas_src>
import jax
import jax.numpy as jnp
from jax.experimental import pallas as pl
from jax.experimental.pallas import tpu as pltpu

# Model dims (module defaults)
INPUT_DIM = 784
HIDDEN1 = 256
HIDDEN2 = 128
NUM_CLASSES = 10
BATCH = 8

# Lane-aligned dims presented to the kernel / MXU.
INPUT_PAD = 896   # 7 * 128 — zero-padded contraction dim of layer 1 (exact)
HEAD_PAD = 128    # lane-dense classifier head; valid columns are [:NUM_CLASSES]


def _mlp_kernel(x_ref, w1_ref, b1_ref, w2_ref, b2_ref, w3_ref, b3_ref, o_ref):
    # 3 MXU matmuls (bf16 operands, f32 accumulation) + f32 VPU bias-add / ReLU,
    # fully fused in VMEM.
    h1 = jnp.dot(x_ref[...], w1_ref[...],
                 preferred_element_type=jnp.float32) + b1_ref[...]
    h1 = jnp.maximum(h1, 0.0)
    h2 = jnp.dot(h1.astype(jnp.bfloat16), w2_ref[...],
                 preferred_element_type=jnp.float32) + b2_ref[...]
    h2 = jnp.maximum(h2, 0.0)
    o_ref[...] = jnp.dot(h2.astype(jnp.bfloat16), w3_ref[...],
                         preferred_element_type=jnp.float32) + b3_ref[...]


def prepare_params(params):
    """One-time (offline) weight prep: zero-pad to lane-aligned shapes, cast
    matmul operands to bf16, keep biases f32."""
    w1, b1, w2, b2, w3, b3 = params
    w1p = (jnp.zeros((INPUT_PAD, HIDDEN1), jnp.float32)
           .at[:INPUT_DIM, :].set(w1)).astype(jnp.bfloat16)
    w2p = w2.astype(jnp.bfloat16)
    w3p = (jnp.zeros((HIDDEN2, HEAD_PAD), jnp.float32)
           .at[:, :NUM_CLASSES].set(w3)).astype(jnp.bfloat16)
    b3p = jnp.zeros((1, HEAD_PAD), jnp.float32).at[:, :NUM_CLASSES].set(b3)
    return (w1p, b1, w2p, b2, w3p, b3p)


def custom_noprop_forward(x, prepared_params):
    """x: [B, INPUT_DIM] float32 -> [B, NUM_CLASSES] float32 (mode='ultra_fast')."""
    w1p, b1, w2p, b2, w3p, b3p = prepared_params
    B = x.shape[0]

    # Free layout plumbing outside the kernel: pad the contraction dim to 896
    # (zeros against zero-padded w1 rows => exact) and cast to bf16.
    x_pad = jnp.pad(x, ((0, 0), (0, INPUT_PAD - INPUT_DIM))).astype(jnp.bfloat16)

    def full_spec(shape):
        # Everything is tiny; whole arrays live in VMEM with a single grid point.
        return pl.BlockSpec(shape, lambda: tuple(0 for _ in shape))

    flops = 2 * B * (INPUT_PAD * HIDDEN1 + HIDDEN1 * HIDDEN2 + HIDDEN2 * HEAD_PAD)
    bytes_accessed = (
        B * INPUT_PAD * 2                                   # x (bf16)
        + (INPUT_PAD * HIDDEN1 + HIDDEN1 * HIDDEN2
           + HIDDEN2 * HEAD_PAD) * 2                        # weights (bf16)
        + (HIDDEN1 + HIDDEN2 + HEAD_PAD) * 4                # biases (f32)
        + B * HEAD_PAD * 4                                  # output (f32)
    )

    out_padded = pl.pallas_call(
        _mlp_kernel,
        out_shape=jax.ShapeDtypeStruct((B, HEAD_PAD), jnp.float32),
        grid=(),
        in_specs=[
            full_spec(x_pad.shape),
            full_spec(w1p.shape),
            full_spec(b1.shape),
            full_spec(w2p.shape),
            full_spec(b2.shape),
            full_spec(w3p.shape),
            full_spec(b3p.shape),
        ],
        out_specs=full_spec((B, HEAD_PAD)),
        cost_estimate=pl.CostEstimate(
            flops=flops, transcendentals=0, bytes_accessed=bytes_accessed),
    )(x_pad, w1p, b1, w2p, b2, w3p, b3p)

    # Lane-dense kernel output -> logical 10-class logits.
    return out_padded[:, :NUM_CLASSES]


def init_params(key):
    """Deterministic parameter init (Kaiming-uniform-ish, like nn.Linear).
    Weights stored as [D_in, D_out] so x @ W + b == F.linear(x, W_pt, b)."""
    ks = jax.random.split(key, 6)

    def linear(kw, kb, fan_in, fan_out):
        bound = 1.0 / jnp.sqrt(fan_in)
        w = jax.random.uniform(kw, (fan_in, fan_out), jnp.float32, -bound, bound)
        b = jax.random.uniform(kb, (1, fan_out), jnp.float32, -bound, bound)
        return w, b

    w1, b1 = linear(ks[0], ks[1], INPUT_DIM, HIDDEN1)
    w2, b2 = linear(ks[2], ks[3], HIDDEN1, HIDDEN2)
    w3, b3 = linear(ks[4], ks[5], HIDDEN2, NUM_CLASSES)
    return (w1, b1, w2, b2, w3, b3)


def reference_forward(x, params):
    w1, b1, w2, b2, w3, b3 = params
    h1 = jnp.maximum(x @ w1 + b1, 0.0)
    h2 = jnp.maximum(h1 @ w2 + b2, 0.0)
    return h2 @ w3 + b3


if __name__ == "__main__":
    key = jax.random.PRNGKey(0)
    kx, kp = jax.random.split(key)
    x = jax.random.normal(kx, (BATCH, INPUT_DIM), jnp.float32)
    params = init_params(kp)
    prepared = prepare_params(params)

    out = custom_noprop_forward(x, prepared)
    out = jax.block_until_ready(out)

    ref = reference_forward(x, params)  # full-f32 reference
    assert out.shape == (BATCH, NUM_CLASSES), out.shape
    # bf16 matmul operands (f32 accumulate) -> relaxed tolerance vs f32 reference.
    assert jnp.allclose(out, ref, atol=5e-2, rtol=5e-2), "mismatch vs JAX reference"

    print("KERNEL_OK")
</pallas_src>

<mosaic_0001>
module attributes {stable_mosaic.version = 11 : i64} {
  func.func @_mlp_kernel(%arg0: memref<8x896xbf16, #tpu.memory_space<vmem>>, %arg1: memref<896x256xbf16, #tpu.memory_space<vmem>>, %arg2: memref<1x256xf32, #tpu.memory_space<vmem>>, %arg3: memref<256x128xbf16, #tpu.memory_space<vmem>>, %arg4: memref<1x128xf32, #tpu.memory_space<vmem>>, %arg5: memref<128x128xbf16, #tpu.memory_space<vmem>>, %arg6: memref<1x128xf32, #tpu.memory_space<vmem>>, %arg7: memref<8x128xf32, #tpu.memory_space<vmem>>) attributes {dimension_semantics = [], scalar_prefetch = 0 : i64, scratch_operands = 0 : i64, tpu.core_type = #tpu.core_type<tc>} {
    %c0 = arith.constant 0 : index
    %c0_0 = arith.constant 0 : index
    %0 = vector.load %arg0[%c0, %c0_0] : memref<8x896xbf16, #tpu.memory_space<vmem>>, vector<8x896xbf16>
    %c0_1 = arith.constant 0 : index
    %c0_2 = arith.constant 0 : index
    %1 = vector.load %arg1[%c0_1, %c0_2] : memref<896x256xbf16, #tpu.memory_space<vmem>>, vector<896x256xbf16>
    %cst = arith.constant dense<0.000000e+00> : vector<8x256xf32>
    %2 = tpu.matmul %0, %1, %cst {dimension_numbers = #tpu.dot_dimension_numbers<[1], [0], [0], [1], [0, 0, 1, 1], [], []>} : vector<8x896xbf16>, vector<896x256xbf16>, vector<8x256xf32> -> vector<8x256xf32>
    %c0_3 = arith.constant 0 : index
    %c0_4 = arith.constant 0 : index
    %3 = vector.load %arg2[%c0_3, %c0_4] : memref<1x256xf32, #tpu.memory_space<vmem>>, vector<1x256xf32>
    %4 = vector.broadcast %3 : vector<1x256xf32> to vector<8x256xf32>
    %5 = arith.addf %2, %4 : vector<8x256xf32>
    %cst_5 = arith.constant 0.000000e+00 : f32
    %6 = vector.broadcast %cst_5 : f32 to vector<8x256xf32>
    %7 = arith.maximumf %5, %6 : vector<8x256xf32>
    %8 = arith.truncf %7 : vector<8x256xf32> to vector<8x256xbf16>
    %c0_6 = arith.constant 0 : index
    %c0_7 = arith.constant 0 : index
    %9 = vector.load %arg3[%c0_6, %c0_7] : memref<256x128xbf16, #tpu.memory_space<vmem>>, vector<256x128xbf16>
    %cst_8 = arith.constant dense<0.000000e+00> : vector<8x128xf32>
    %10 = tpu.matmul %8, %9, %cst_8 {dimension_numbers = #tpu.dot_dimension_numbers<[1], [0], [0], [1], [0, 0, 1, 1], [], []>} : vector<8x256xbf16>, vector<256x128xbf16>, vector<8x128xf32> -> vector<8x128xf32>
    %c0_9 = arith.constant 0 : index
    %c0_10 = arith.constant 0 : index
    %11 = vector.load %arg4[%c0_9, %c0_10] : memref<1x128xf32, #tpu.memory_space<vmem>>, vector<1x128xf32>
    %12 = vector.broadcast %11 : vector<1x128xf32> to vector<8x128xf32>
    %13 = arith.addf %10, %12 : vector<8x128xf32>
    %cst_11 = arith.constant 0.000000e+00 : f32
    %14 = vector.broadcast %cst_11 : f32 to vector<8x128xf32>
    %15 = arith.maximumf %13, %14 : vector<8x128xf32>
    %16 = arith.truncf %15 : vector<8x128xf32> to vector<8x128xbf16>
    %c0_12 = arith.constant 0 : index
    %c0_13 = arith.constant 0 : index
    %17 = vector.load %arg5[%c0_12, %c0_13] : memref<128x128xbf16, #tpu.memory_space<vmem>>, vector<128x128xbf16>
    %cst_14 = arith.constant dense<0.000000e+00> : vector<8x128xf32>
    %18 = tpu.matmul %16, %17, %cst_14 {dimension_numbers = #tpu.dot_dimension_numbers<[1], [0], [0], [1], [0, 0, 1, 1], [], []>} : vector<8x128xbf16>, vector<128x128xbf16>, vector<8x128xf32> -> vector<8x128xf32>
    %c0_15 = arith.constant 0 : index
    %c0_16 = arith.constant 0 : index
    %19 = vector.load %arg6[%c0_15, %c0_16] : memref<1x128xf32, #tpu.memory_space<vmem>>, vector<1x128xf32>
    %20 = vector.broadcast %19 : vector<1x128xf32> to vector<8x128xf32>
    %21 = arith.addf %18, %20 : vector<8x128xf32>
    %c0_17 = arith.constant 0 : index
    %c0_18 = arith.constant 0 : index
    %22 = vector.load %arg7[%c0_17, %c0_18] : memref<8x128xf32, #tpu.memory_space<vmem>>, vector<8x128xf32>
    tpu.vector_store %arg7[%c0_17, %c0_18], %21 {strides = array<i32>} : memref<8x128xf32, #tpu.memory_space<vmem>>, vector<8x128xf32>,
    return
  }
}

</mosaic_0001>

<bundles_post_ra>
// kernel: tpu_custom_call.1
= control target key start
LH: loop header
LB: loop body
LE: loop exit
PB: predicated region body
PF: predicated region fallthrough
CT: control target
= control target key end

     0   :  { %12 = vsyncpa [#allocation3], 0  ;;  %s2201_s0 = inlined_call_operand.hbm [shape: bf16[8,896], index: 0, kind: input, shape index: {}]   ;;  %s2202_s1 = inlined_call_operand.hbm [shape: bf16[896,256], index: 1, kind: input, shape index: {}]   ;;  %s2203_s2 = inlined_call_operand.hbm [shape: f32[1,256], index: 2, kind: input, shape index: {}]   ;;  %s2204_s3 = inlined_call_operand.hbm [shape: bf16[256,128], index: 3, kind: input, shape index: {}]   ;;  %s2205_s4 = inlined_call_operand.vmem [shape: f32[1,128], index: 4, kind: input, shape index: {}]   ;;  %s2206_s5 = inlined_call_operand.hbm [shape: bf16[128,128], index: 5, kind: input, shape index: {}]   ;;  %s2207_s6 = inlined_call_operand.vmem [shape: f32[1,128], index: 6, kind: input, shape index: {}]   ;;  %s2208_s7 = inlined_call_operand.hbm [shape: f32[8,128], index: 7, kind: output, shape index: {}]  }
   0x1   :  { %13 = vsyncpa [#allocation6], 0 }
   0x2   :  { %14 = vsyncpa [#allocation9], 0  ;;  %s31_s26 = sshll.u32 %s2202_s1, 4  ;;  %s32_s26 = int_to_ptr.hbm [resolvable:$true] %s31_s26 }
   0x3   :  { %15 = vsyncpa [#allocation4], 0  ;;  %s2099_s27 = smov [#allocation5]   ;;  %s55_s8 = sshll.u32 %s2204_s3, 4  ;;  %s56_s8 = int_to_ptr.hbm [resolvable:$true] %s55_s8 }
   0x4   :  { %s33_s28 = sshll.u32 %s2099_s27, 4  ;;  %s2100_s9 = smov 128   ;;  %s34_s28 = int_to_ptr.vmem [resolvable:$true] %s33_s28 }
   0x5   :  { %s2101_s10 = smov 8   ;;  %s2102_s11 = smov [#allocation8]  }
   0x6   :  { %39 = dma.hbm_to_vmem [thread:$0]  %s32_s26, 14336, %s34_s28, [#allocation6], %s2100_s9, %s2100_s9, %s2101_s10  }
   0x7   :  { %s57_s12 = sshll.u32 %s2102_s11, 4  ;;  %s2103_s13 = smov 64   ;;  %s58_s12 = int_to_ptr.vmem [resolvable:$true] %s57_s12 }
   0x8   :  { %s2104_s14 = smov 4   ;;  %s21_s16 = sshll.u32 %s2201_s0, 4  ;;  %s22_s16 = int_to_ptr.hbm [resolvable:$true] %s21_s16 }
   0x9   :  { %63 = dma.hbm_to_vmem [thread:$0]  %s56_s8, 2048, %s58_s12, [#allocation9], %s2103_s13, %s2103_s13, %s2104_s14  }
   0xa   :  { %s2105_s17 = smov [#allocation2]   ;;  %s45_s20 = sshll.u32 %s2203_s2, 4  ;;  %s46_s20 = int_to_ptr.hbm [resolvable:$true] %s45_s20 }
   0xb   :  { %s23_s18 = sshll.u32 %s2105_s17, 4  ;;  %s2106_s21 = smov [#allocation7]   ;;  %s24_s18 = int_to_ptr.vmem [resolvable:$true] %s23_s18 }
   0xc   :  { %26 = dma.hbm_to_vmem [thread:$0]  %s22_s16, 448, %s24_s18, [#allocation3]  }
   0xd   :  { %s47_s22 = sshll.u32 %s2106_s21, 4  ;;  %s70_s25 = sshll.u32 %s2206_s5, 4  ;;  %s48_s22 = int_to_ptr.vmem [resolvable:$true] %s47_s22  ;;  %s71_s25 = int_to_ptr.hbm [resolvable:$true] %s70_s25 }
   0xe   :  { %50 = dma.hbm_to_vmem [thread:$0]  %s46_s20, 32, %s48_s22, [#allocation6]  }
   0xf   :  { %s2107_s0 = smov [#allocation10]  }
  0x10   :  { %s72_s26 = sshll.u32 %s2107_s0, 4  ;;  %s73_s26 = int_to_ptr.vmem [resolvable:$true] %s72_s26 }
  0x11   :  { %78 = dma.hbm_to_vmem [thread:$0]  %s71_s25, 1024, %s73_s26, [#allocation9], %s2103_s13, %s2103_s13, %s2104_s14  }
  0x12   :  { %2091 = dma.done.wait [#allocation3], 448  }
  0x13   :  { %2092 = vsyncadd [#allocation3], 4294966848 }
  0x14   :  { %2093 = dma.done.wait [#allocation6], 14368  }
  0x15   :  { %2094 = vsyncadd [#allocation6], 4294952928 }
  0x16   :  { %2095 = dma.done.wait [#allocation9], 3072  }
  0x17   :  { %2096 = vsyncadd [#allocation9], 4294964224  ;;  %v1313_v0 = vld [vmem:[#allocation5 + $0x70] sm:$0xf]  ;;  %v1814_v1 = vld [vmem:[#allocation5 + $0x74] sm:$0xf0] }
  0x18   :  { %v1377_v2 = vld [vmem:[#allocation5 + $0xf0] sm:$0xf]  ;;  %v1314_v3 = vor.u32 %v1814_v1, %v1313_v0  ;;  %v1830_v4 = vld [vmem:[#allocation5 + $0xf4] sm:$0xf0]  ;;  %v1305_v9 = vld [vmem:[#allocation5 + $0x60] sm:$0xf] }
  0x19   :  { %v1441_v5 = vld [vmem:[#allocation5 + $0x170] sm:$0xf]  ;;  %v1846_v6 = vld [vmem:[#allocation5 + $0x174] sm:$0xf0]  ;;  %v1378_v7 = vor.u32 %v1830_v4, %v1377_v2  ;;  %v1812_v10 = vld [vmem:[#allocation5 + $0x64] sm:$0xf0] }
  0x1a   :  { %v1442_v8 = vor.u32 %v1846_v6, %v1441_v5  ;;  %v1369_v11 = vld [vmem:[#allocation5 + $0xe0] sm:$0xf]  ;;  %808 = vmatpush.bf16.msra.mxu0 %v1314_v3  ;;  %v1306_v12 = vor.u32 %v1812_v10, %v1305_v9  ;;  %v1828_v13 = vld [vmem:[#allocation5 + $0xe4] sm:$0xf0]  ;;  %v1297_v18 = vld [vmem:[#allocation5 + $0x50] sm:$0xf] }
  0x1b   :  { %v1433_v14 = vld [vmem:[#allocation5 + $0x160] sm:$0xf]  ;;  %v1844_v15 = vld [vmem:[#allocation5 + $0x164] sm:$0xf0]  ;;  %821 = vmatpush.bf16.msra.mxu1 %v1378_v7  ;;  %v1370_v16 = vor.u32 %v1828_v13, %v1369_v11  ;;  %v1810_v19 = vld [vmem:[#allocation5 + $0x54] sm:$0xf0] }
  0x1c   :  { %834 = vmatpush.bf16.msra.mxu2 %v1442_v8  ;;  %v1434_v17 = vor.u32 %v1844_v15, %v1433_v14  ;;  %v1361_v20 = vld [vmem:[#allocation5 + $0xd0] sm:$0xf]  ;;  %v1826_v21 = vld [vmem:[#allocation5 + $0xd4] sm:$0xf0]  ;;  %v1298_v24 = vor.u32 %v1810_v19, %v1297_v18  ;;  %v1289_v25 = vld [vmem:[#allocation5 + $0x40] sm:$0xf] }
  0x1d   :  { %v1425_v22 = vld [vmem:[#allocation5 + $0x150] sm:$0xf]  ;;  %v1842_v23 = vld [vmem:[#allocation5 + $0x154] sm:$0xf0]  ;;  %v1808_v26 = vld [vmem:[#allocation5 + $0x44] sm:$0xf0]  ;;  %v1362_v27 = vor.u32 %v1826_v21, %v1361_v20 }
  0x1e   :  { %809 = vmatpush.bf16.msra.mxu0 %v1306_v12  ;;  %v1426_v28 = vor.u32 %v1842_v23, %v1425_v22  ;;  %v1353_v29 = vld [vmem:[#allocation5 + $0xc0] sm:$0xf]  ;;  %v1505_v30 = vld [vmem:[#allocation5 + $0x1f0] sm:$0xf]  ;;  %v1862_v31 = vld [vmem:[#allocation5 + $0x1f4] sm:$0xf0]  ;;  %v1290_v37 = vor.u32 %v1808_v26, %v1289_v25 }
  0x1f   :  { %822 = vmatpush.bf16.msra.mxu1 %v1370_v16  ;;  %v1824_v32 = vld [vmem:[#allocation5 + $0xc4] sm:$0xf0]  ;;  %v1417_v33 = vld [vmem:[#allocation5 + $0x140] sm:$0xf]  ;;  %v1506_v35 = vor.u32 %v1862_v31, %v1505_v30  ;;  %v1281_v38 = vld [vmem:[#allocation5 + $0x30] sm:$0xf] }
  0x20   :  { %835 = vmatpush.bf16.msra.mxu2 %v1434_v17  ;;  %v1840_v34 = vld [vmem:[#allocation5 + $0x144] sm:$0xf0]  ;;  %v1497_v36 = vld [vmem:[#allocation5 + $0x1e0] sm:$0xf]  ;;  %v1806_v39 = vld [vmem:[#allocation5 + $0x34] sm:$0xf0]  ;;  %v1354_v41 = vor.u32 %v1824_v32, %v1353_v29 }
  0x21   :  { %847 = vmatpush.bf16.msra.mxu3 %v1506_v35  ;;  %v1860_v40 = vld [vmem:[#allocation5 + $0x1e4] sm:$0xf0]  ;;  %v1418_v42 = vor.u32 %v1840_v34, %v1417_v33  ;;  %v1345_v43 = vld [vmem:[#allocation5 + $0xb0] sm:$0xf]  ;;  %v1822_v44 = vld [vmem:[#allocation5 + $0xb4] sm:$0xf0]  ;;  %v1282_v50 = vor.u32 %v1806_v39, %v1281_v38 }
  0x22   :  { %810 = vmatpush.bf16.msra.mxu0 %v1298_v24  ;;  %v1409_v45 = vld [vmem:[#allocation5 + $0x130] sm:$0xf]  ;;  %v1498_v46 = vor.u32 %v1860_v40, %v1497_v36  ;;  %v1838_v47 = vld [vmem:[#allocation5 + $0x134] sm:$0xf0]  ;;  %v1273_v51 = vld [vmem:[#allocation5 + $0x20] sm:$0xf]  ;;  %v1346_v54 = vor.u32 %v1822_v44, %v1345_v43 }
  0x23   :  { %823 = vmatpush.bf16.msra.mxu1 %v1362_v27  ;;  %v1489_v48 = vld [vmem:[#allocation5 + $0x1d0] sm:$0xf]  ;;  %v1858_v49 = vld [vmem:[#allocation5 + $0x1d4] sm:$0xf0]  ;;  %v1804_v52 = vld [vmem:[#allocation5 + $0x24] sm:$0xf0]  ;;  %v1410_v55 = vor.u32 %v1838_v47, %v1409_v45 }
  0x24   :  { %836 = vmatpush.bf16.msra.mxu2 %v1426_v28  ;;  %v1490_v53 = vor.u32 %v1858_v49, %v1489_v48  ;;  %v1337_v56 = vld [vmem:[#allocation5 + $0xa0] sm:$0xf]  ;;  %v1856_v58 = vld [vmem:[#allocation5 + $0x1c4] sm:$0xf0]  ;;  %v1274_v62 = vor.u32 %v1804_v52, %v1273_v51  ;;  %v1265_v63 = vld [vmem:[#allocation5 + $0x10] sm:$0xf] }
  0x25   :  { %848 = vmatpush.bf16.msra.mxu3 %v1498_v46  ;;  %v1481_v57 = vld [vmem:[#allocation5 + $0x1c0] sm:$0xf]  ;;  %v1820_v59 = vld [vmem:[#allocation5 + $0xa4] sm:$0xf0]  ;;  %v1802_v0 = vld [vmem:[#allocation5 + $0x14] sm:$0xf0] }
  0x26   :  { %811 = vmatpush.bf16.msra.mxu0 %v1290_v37  ;;  %v1401_v60 = vld [vmem:[#allocation5 + $0x120] sm:$0xf]  ;;  %v1836_v61 = vld [vmem:[#allocation5 + $0x124] sm:$0xf0]  ;;  %v1482_v1 = vor.u32 %v1856_v58, %v1481_v57  ;;  %v1338_v2 = vor.u32 %v1820_v59, %v1337_v56  ;;  %v1329_v4 = vld [vmem:[#allocation5 + $0x90] sm:$0xf]  ;;  %v1266_v10 = vor.u32 %v1802_v0, %v1265_v63 }
  0x27   :  { %824 = vmatpush.bf16.msra.mxu1 %v1354_v41  ;;  %v1402_v3 = vor.u32 %v1836_v61, %v1401_v60  ;;  %v1473_v5 = vld [vmem:[#allocation5 + $0x1b0] sm:$0xf]  ;;  %v1854_v6 = vld [vmem:[#allocation5 + $0x1b4] sm:$0xf0]  ;;  %v1257_v11 = vld [vmem:[#allocation5] sm:$0xf] }
  0x28   :  { %837 = vmatpush.bf16.msra.mxu2 %v1418_v42  ;;  %v1818_v7 = vld [vmem:[#allocation5 + $0x94] sm:$0xf0]  ;;  %v1393_v8 = vld [vmem:[#allocation5 + $0x110] sm:$0xf]  ;;  %v1800_v12 = vld [vmem:[#allocation5 + $0x4] sm:$0xf0]  ;;  %v1474_v14 = vor.u32 %v1854_v6, %v1473_v5 }
  0x29   :  { %849 = vmatpush.bf16.msra.mxu3 %v1490_v53  ;;  %v1834_v9 = vld [vmem:[#allocation5 + $0x114] sm:$0xf0]  ;;  %v1321_v13 = vld [vmem:[#allocation5 + $0x80] sm:$0xf]  ;;  %v1330_v15 = vor.u32 %v1818_v7, %v1329_v4  ;;  %v1816_v17 = vld [vmem:[#allocation5 + $0x84] sm:$0xf0]  ;;  %v1258_v26 = vor.u32 %v1800_v12, %v1257_v11 }
  0x2a   :  { %812 = vmatpush.bf16.msra.mxu0 %v1282_v50  ;;  %v1394_v16 = vor.u32 %v1834_v9, %v1393_v8  ;;  %v1465_v18 = vld [vmem:[#allocation5 + $0x1a0] sm:$0xf]  ;;  %v1852_v19 = vld [vmem:[#allocation5 + $0x1a4] sm:$0xf0]  ;;  %v1569_v22 = vld [vmem:[#allocation5 + $0x270] sm:$0xf]  ;;  %v1322_v30 = vor.u32 %v1816_v17, %v1321_v13 }
  0x2b   :  { %825 = vmatpush.bf16.msra.mxu1 %v1346_v54  ;;  %v1385_v20 = vld [vmem:[#allocation5 + $0x100] sm:$0xf]  ;;  %v1832_v21 = vld [vmem:[#allocation5 + $0x104] sm:$0xf0]  ;;  %v1878_v23 = vld [vmem:[#allocation5 + $0x274] sm:$0xf0]  ;;  %v1466_v29 = vor.u32 %v1852_v19, %v1465_v18 }
  0x2c   :  { %838 = vmatpush.bf16.msra.mxu2 %v1410_v55  ;;  %v1633_v24 = vld [vmem:[#allocation5 + $0x2f0] sm:$0xf]  ;;  %v1894_v25 = vld [vmem:[#allocation5 + $0x2f4] sm:$0xf0]  ;;  %v1386_v31 = vor.u32 %v1832_v21, %v1385_v20  ;;  %v1570_v34 = vor.u32 %v1878_v23, %v1569_v22  ;;  %v1561_v36 = vld [vmem:[#allocation5 + $0x260] sm:$0xf] }
  0x2d   :  { %850 = vmatpush.bf16.msra.mxu3 %v1482_v1  ;;  %v1697_v27 = vld [vmem:[#allocation5 + $0x370] sm:$0xf]  ;;  %v1910_v28 = vld [vmem:[#allocation5 + $0x374] sm:$0xf0]  ;;  %v1634_v35 = vor.u32 %v1894_v25, %v1633_v24  ;;  %v1876_v37 = vld [vmem:[#allocation5 + $0x264] sm:$0xf0] }
  0x2e   :  { %813 = vmatpush.bf16.msra.mxu0 %v1274_v62  ;;  %v1457_v32 = vld [vmem:[#allocation5 + $0x190] sm:$0xf]  ;;  %v1850_v33 = vld [vmem:[#allocation5 + $0x194] sm:$0xf0]  ;;  %v1698_v38 = vor.u32 %v1910_v28, %v1697_v27  ;;  %v1625_v39 = vld [vmem:[#allocation5 + $0x2e0] sm:$0xf]  ;;  %v1562_v46 = vor.u32 %v1876_v37, %v1561_v36 }
  0x2f   :  { %826 = vmatpush.bf16.msra.mxu1 %v1338_v2  ;;  %v1892_v40 = vld [vmem:[#allocation5 + $0x2e4] sm:$0xf0]  ;;  %v102_v41 = vld [vmem:[#allocation2 + $0x8] sm:$0xff]  ;;  %v1689_v42 = vld [vmem:[#allocation5 + $0x360] sm:$0xf]  ;;  %v1458_v44 = vor.u32 %v1850_v33, %v1457_v32  ;;  %s2108_s29 = smov [#allocation11]  }
  0x30   :  { %839 = vmatpush.bf16.msra.mxu2 %v1402_v3  ;;  %v1908_v43 = vld [vmem:[#allocation5 + $0x364] sm:$0xf0]  ;;  %v229_v45 = vunpack.c.l.b16 %v102_v41  ;;  %v1449_v47 = vld [vmem:[#allocation5 + $0x180] sm:$0xf]  ;;  %v1626_v50 = vor.u32 %v1892_v40, %v1625_v39  ;;  %v1553_v51 = vld [vmem:[#allocation5 + $0x250] sm:$0xf]  ;;  %v230_v61 = vunpack.c.h.b16 %v102_v41 }
  0x31   :  { %851 = vmatpush.bf16.msra.mxu3 %v1474_v14  ;;  %v1848_v48 = vld [vmem:[#allocation5 + $0x184] sm:$0xf0]  ;;  %v1813_v52 = vld [vmem:[#allocation5 + $0x74] sm:$0xf]  ;;  %v1315_v53 = vld [vmem:[#allocation5 + $0x78] sm:$0xf0]  ;;  %v1690_v57 = vor.u32 %v1908_v43, %v1689_v42 }
  0x32   :  { %814 = vmatpush.bf16.msra.mxu0 %v1266_v10  ;;  %v101_v49 = vld [vmem:[#allocation2] sm:$0xff]  ;;  %v2164_v54 = vpack.c.b16 %v229_v45, %v229_v45  ;;  %v1874_v58 = vld [vmem:[#allocation5 + $0x254] sm:$0xf0]  ;;  %v1617_v59 = vld [vmem:[#allocation5 + $0x2d0] sm:$0xf]  ;;  %v1450_v0 = vor.u32 %v1848_v48, %v1449_v47  ;;  %v1318_v3 = vor.u32 %v1813_v52, %v1315_v53  ;;  %v2172_v13 = vpack.c.b16 %v230_v61, %v230_v61  ;;  %s1241_s30 = sshll.u32 %s2108_s29, 4  ;;  %s1242_s30 = int_to_ptr.vmem [resolvable:$true] %s1241_s30 }
  0x33   :  { %827 = vmatpush.bf16.msra.mxu1 %v1330_v15  ;;  %v227_v55 = vunpack.c.l.b16 %v101_v49  ;;  %v228_v56 = vunpack.c.h.b16 %v101_v49  ;;  %v1890_v60 = vld [vmem:[#allocation5 + $0x2d4] sm:$0xf0]  ;;  %v1681_v62 = vld [vmem:[#allocation5 + $0x350] sm:$0xf]  ;;  %v1554_v4 = vor.u32 %v1874_v58, %v1553_v51  ;;  %v1545_v6 = vld [vmem:[#allocation5 + $0x240] sm:$0xf] }
  0x34   :  { %840 = vmatpush.bf16.msra.mxu2 %v1394_v16  ;;  %v1906_v63 = vld [vmem:[#allocation5 + $0x354] sm:$0xf0]  ;;  %v1618_v5 = vor.u32 %v1890_v60, %v1617_v59  ;;  %v1811_v7 = vld [vmem:[#allocation5 + $0x64] sm:$0xf]  ;;  %v1307_v8 = vld [vmem:[#allocation5 + $0x68] sm:$0xf0] }
  0x35   :  { %852 = vmatpush.bf16.msra.mxu3 %v1466_v29  ;;  %v2167_v1 = vpack.c.b16 %v227_v55, %v227_v55  ;;  %v2169_v2 = vpack.c.b16 %v228_v56, %v228_v56  ;;  %v1682_v9 = vor.u32 %v1906_v63, %v1681_v62  ;;  %v1872_v10 = vld [vmem:[#allocation5 + $0x244] sm:$0xf0]  ;;  %v1609_v11 = vld [vmem:[#allocation5 + $0x2c0] sm:$0xf]  ;;  %v1310_v16 = vor.u32 %v1811_v7, %v1307_v8  ;;  %v1537_v19 = vld [vmem:[#allocation5 + $0x230] sm:$0xf] }
  0x36   :  { %815 = vmatpush.bf16.msra.mxu0 %v1258_v26  ;;  %v1888_v12 = vld [vmem:[#allocation5 + $0x2c4] sm:$0xf0]  ;;  %v1673_v14 = vld [vmem:[#allocation5 + $0x340] sm:$0xf]  ;;  %v1546_v17 = vor.u32 %v1872_v10, %v1545_v6  ;;  %v1809_v20 = vld [vmem:[#allocation5 + $0x54] sm:$0xf] }
  0x37   :  { %828 = vmatpush.bf16.msra.mxu1 %v1322_v30  ;;  %v1904_v15 = vld [vmem:[#allocation5 + $0x344] sm:$0xf0]  ;;  %v1610_v18 = vor.u32 %v1888_v12, %v1609_v11  ;;  %v1299_v21 = vld [vmem:[#allocation5 + $0x58] sm:$0xf0]  ;;  %v1870_v23 = vld [vmem:[#allocation5 + $0x234] sm:$0xf0] }
  0x38   :  { %841 = vmatpush.bf16.msra.mxu2 %v1386_v31  ;;  %v1674_v22 = vor.u32 %v1904_v15, %v1673_v14  ;;  %v1601_v24 = vld [vmem:[#allocation5 + $0x2b0] sm:$0xf]  ;;  %v1886_v25 = vld [vmem:[#allocation5 + $0x2b4] sm:$0xf0]  ;;  %v1302_v28 = vor.u32 %v1809_v20, %v1299_v21  ;;  %v1538_v29 = vor.u32 %v1870_v23, %v1537_v19  ;;  %v1529_v31 = vld [vmem:[#allocation5 + $0x220] sm:$0xf] }
  0x39   :  { %853 = vmatpush.bf16.msra.mxu3 %v1458_v44  ;;  %816 = vmatmul.bf16.vlgmr.msra.gmra.mxu0 %v2167_v1  ;;  %v1665_v26 = vld [vmem:[#allocation5 + $0x330] sm:$0xf]  ;;  %v1902_v27 = vld [vmem:[#allocation5 + $0x334] sm:$0xf0]  ;;  %v1602_v30 = vor.u32 %v1886_v25, %v1601_v24  ;;  %v1807_v32 = vld [vmem:[#allocation5 + $0x44] sm:$0xf] }
  0x3a   :  { %860 = vmatpush.bf16.msrb.mxu0 %v1570_v34  ;;  %829 = vmatmul.bf16.vlgmr.msra.gmra.mxu1 %v2169_v2  ;;  %v1291_v33 = vld [vmem:[#allocation5 + $0x48] sm:$0xf0]  ;;  %v1666_v34 = vor.u32 %v1902_v27, %v1665_v26  ;;  %v1593_v36 = vld [vmem:[#allocation5 + $0x2a0] sm:$0xf]  ;;  %v1884_v37 = vld [vmem:[#allocation5 + $0x2a4] sm:$0xf0] }
  0x3b   :  { %873 = vmatpush.bf16.msrb.mxu1 %v1634_v35  ;;  %842 = vmatmul.bf16.vlgmr.msra.gmra.mxu2 %v2164_v54  ;;  %v1868_v35 = vld [vmem:[#allocation5 + $0x224] sm:$0xf0]  ;;  %v1294_v40 = vor.u32 %v1807_v32, %v1291_v33  ;;  %v1594_v42 = vor.u32 %v1884_v37, %v1593_v36  ;;  %v1521_v43 = vld [vmem:[#allocation5 + $0x210] sm:$0xf]  ;;  %v1805_v44 = vld [vmem:[#allocation5 + $0x34] sm:$0xf] }
  0x3c   :  { %886 = vmatpush.bf16.msrb.mxu2 %v1698_v38  ;;  %v1657_v38 = vld [vmem:[#allocation5 + $0x320] sm:$0xf]  ;;  %v1900_v39 = vld [vmem:[#allocation5 + $0x324] sm:$0xf0]  ;;  %v1530_v41 = vor.u32 %v1868_v35, %v1529_v31  ;;  %v1283_v45 = vld [vmem:[#allocation5 + $0x38] sm:$0xf0] }
  0x3d   :  { %854 = vmatpush.bf16.msra.mxu3 %v1450_v0  ;;  %v1866_v47 = vld [vmem:[#allocation5 + $0x214] sm:$0xf0]  ;;  %v1585_v48 = vld [vmem:[#allocation5 + $0x290] sm:$0xf]  ;;  %v1513_v52 = vld [vmem:[#allocation5 + $0x200] sm:$0xf] }
  0x3e   :  { %861 = vmatpush.bf16.msrb.mxu0 %v1562_v46  ;;  %v1658_v46 = vor.u32 %v1900_v39, %v1657_v38  ;;  %v1882_v49 = vld [vmem:[#allocation5 + $0x294] sm:$0xf0]  ;;  %v1864_v53 = vld [vmem:[#allocation5 + $0x204] sm:$0xf0]  ;;  %v1577_v55 = vld [vmem:[#allocation5 + $0x280] sm:$0xf]  ;;  %v1522_v58 = vor.u32 %v1866_v47, %v1521_v43 }
  0x3f   :  { %874 = vmatpush.bf16.msrb.mxu1 %v1626_v50  ;;  %v1649_v50 = vld [vmem:[#allocation5 + $0x310] sm:$0xf]  ;;  %v1898_v51 = vld [vmem:[#allocation5 + $0x314] sm:$0xf0]  ;;  %v1880_v56 = vld [vmem:[#allocation5 + $0x284] sm:$0xf0]  ;;  %v1586_v59 = vor.u32 %v1882_v49, %v1585_v48  ;;  %v1514_v15 = vor.u32 %v1864_v53, %v1513_v52 }
  0x40   :  { %887 = vmatpush.bf16.msrb.mxu2 %v1690_v57  ;;  %855 = vmatmul.bf16.vlgmr.msra.gmra.mxu3 %v2172_v13  ;;  %v1286_v57 = vor.u32 %v1805_v44, %v1283_v45  ;;  %v103_v60 = vld [vmem:[#allocation2 + $0x10] sm:$0xff]  ;;  %v1803_v61 = vld [vmem:[#allocation5 + $0x24] sm:$0xf]  ;;  %v1275_v62 = vld [vmem:[#allocation5 + $0x28] sm:$0xf0]  ;;  %v1650_v63 = vor.u32 %v1898_v51, %v1649_v50  ;;  %s1243_s10 = sshll.u32 %s2208_s7, 4  ;;  %s1244_s10 = int_to_ptr.hbm [resolvable:$true] %s1243_s10 }
  0x41   :  { %899 = vmatpush.bf16.msrb.mxu3 %v1318_v3  ;;  %v1641_v0 = vld [vmem:[#allocation5 + $0x300] sm:$0xf]  ;;  %v1896_v3 = vld [vmem:[#allocation5 + $0x304] sm:$0xf0]  ;;  %v1379_v6 = vld [vmem:[#allocation5 + $0xf8] sm:$0xf0]  ;;  %v1278_v10 = vor.u32 %v1803_v61, %v1275_v62  ;;  %v232_v11 = vunpack.c.h.b16 %v103_v60 }
  0x42   :  { %862 = vmatpush.bf16.msrb.mxu0 %v1554_v4  ;;  %v104_v4 = vld [vmem:[#allocation2 + $0x18] sm:$0xf]  ;;  %v1845_v7 = vld [vmem:[#allocation5 + $0x174] sm:$0xf]  ;;  %v1827_v23 = vld [vmem:[#allocation5 + $0xe4] sm:$0xf] }
  0x43   :  { %875 = vmatpush.bf16.msrb.mxu1 %v1618_v5  ;;  %v1829_v5 = vld [vmem:[#allocation5 + $0xf4] sm:$0xf]  ;;  %v1443_v8 = vld [vmem:[#allocation5 + $0x178] sm:$0xf0]  ;;  %v1371_v24 = vld [vmem:[#allocation5 + $0xe8] sm:$0xf0] }
  0x44   :  { %888 = vmatpush.bf16.msrb.mxu2 %v1682_v9  ;;  %v231_v9 = vunpack.c.l.b16 %v103_v60  ;;  %v1861_v12 = vld [vmem:[#allocation5 + $0x1f4] sm:$0xf]  ;;  %v1507_v14 = vld [vmem:[#allocation5 + $0x1f8] sm:$0xf0]  ;;  %v1382_v19 = vor.u32 %v1829_v5, %v1379_v6  ;;  %v1843_v25 = vld [vmem:[#allocation5 + $0x164] sm:$0xf]  ;;  %v1374_v35 = vor.u32 %v1827_v23, %v1371_v24 }
  0x45   :  { %900 = vmatpush.bf16.msrb.mxu3 %v1310_v16  ;;  %v1578_v16 = vor.u32 %v1880_v56, %v1577_v55  ;;  %v1801_v20 = vld [vmem:[#allocation5 + $0x14] sm:$0xf]  ;;  %v1267_v21 = vld [vmem:[#allocation5 + $0x18] sm:$0xf0]  ;;  %v1510_v26 = vor.u32 %v1861_v12, %v1507_v14  ;;  %v1499_v31 = vld [vmem:[#allocation5 + $0x1e8] sm:$0xf0] }
  0x46   :  { %863 = vmatpush.bf16.msrb.mxu0 %v1546_v17  ;;  %v233_v17 = vunpack.c.l.b16 %v104_v4  ;;  %v2176_v27 = vpack.c.b16 %v231_v9, %v231_v9  ;;  %v1270_v33 = vor.u32 %v1801_v20, %v1267_v21  ;;  %v1363_v36 = vld [vmem:[#allocation5 + $0xd8] sm:$0xf0]  ;;  %v1799_v37 = vld [vmem:[#allocation5 + $0x4] sm:$0xf]  ;;  %v1259_v38 = vld [vmem:[#allocation5 + $0x8] sm:$0xf0] }
  0x47   :  { %876 = vmatpush.bf16.msrb.mxu1 %v1610_v18  ;;  %v1642_v18 = vor.u32 %v1896_v3, %v1641_v0  ;;  %v1427_v44 = vld [vmem:[#allocation5 + $0x158] sm:$0xf0]  ;;  %v1857_v45 = vld [vmem:[#allocation5 + $0x1d4] sm:$0xf]  ;;  %v1262_v47 = vor.u32 %v1799_v37, %v1259_v38  ;;  %v1823_v49 = vld [vmem:[#allocation5 + $0xc4] sm:$0xf] }
  0x48   :  { %889 = vmatpush.bf16.msrb.mxu2 %v1674_v22  ;;  %v1446_v22 = vor.u32 %v1845_v7, %v1443_v8  ;;  %v2180_v32 = vpack.c.b16 %v233_v17, %v233_v17  ;;  %v1355_v50 = vld [vmem:[#allocation5 + $0xc8] sm:$0xf0]  ;;  %v1839_v53 = vld [vmem:[#allocation5 + $0x144] sm:$0xf]  ;;  %v1821_v61 = vld [vmem:[#allocation5 + $0xb4] sm:$0xf] }
  0x49   :  { %901 = vmatpush.bf16.msrb.mxu3 %v1302_v28  ;;  %v1435_v28 = vld [vmem:[#allocation5 + $0x168] sm:$0xf0]  ;;  %v1875_v55 = vld [vmem:[#allocation5 + $0x264] sm:$0xf]  ;;  %v1358_v62 = vor.u32 %v1823_v49, %v1355_v50  ;;  %v1837_v0 = vld [vmem:[#allocation5 + $0x134] sm:$0xf] }
  0x4a   :  { %864 = vmatpush.bf16.msrb.mxu0 %v1538_v29  ;;  %v2178_v29 = vpack.c.b16 %v232_v11, %v232_v11  ;;  %v1438_v39 = vor.u32 %v1843_v25, %v1435_v28  ;;  %v1563_v56 = vld [vmem:[#allocation5 + $0x268] sm:$0xf0]  ;;  %v1873_v5 = vld [vmem:[#allocation5 + $0x254] sm:$0xf]  ;;  %v1555_v6 = vld [vmem:[#allocation5 + $0x258] sm:$0xf0] }
  0x4b   :  { %877 = vmatpush.bf16.msrb.mxu1 %v1602_v30  ;;  %v1859_v30 = vld [vmem:[#allocation5 + $0x1e4] sm:$0xf]  ;;  %v1483_v60 = vld [vmem:[#allocation5 + $0x1c8] sm:$0xf0]  ;;  %v1566_v3 = vor.u32 %v1875_v55, %v1563_v56  ;;  %v1411_v8 = vld [vmem:[#allocation5 + $0x138] sm:$0xf0] }
  0x4c   :  { %890 = vmatpush.bf16.msrb.mxu2 %v1666_v34  ;;  %v1825_v34 = vld [vmem:[#allocation5 + $0xd4] sm:$0xf]  ;;  %v1502_v43 = vor.u32 %v1859_v30, %v1499_v31  ;;  %v1819_v12 = vld [vmem:[#allocation5 + $0xa4] sm:$0xf]  ;;  %v1339_v14 = vld [vmem:[#allocation5 + $0xa8] sm:$0xf0] }
  0x4d   :  { %902 = vmatpush.bf16.msrb.mxu3 %v1294_v40  ;;  %v1841_v40 = vld [vmem:[#allocation5 + $0x154] sm:$0xf]  ;;  %v1366_v48 = vor.u32 %v1825_v34, %v1363_v36  ;;  %v1835_v17 = vld [vmem:[#allocation5 + $0x124] sm:$0xf]  ;;  %v1403_v21 = vld [vmem:[#allocation5 + $0x128] sm:$0xf0]  ;;  %v1342_v24 = vor.u32 %v1819_v12, %v1339_v14 }
  0x4e   :  { %865 = vmatpush.bf16.msrb.mxu0 %v1530_v41  ;;  %v1877_v41 = vld [vmem:[#allocation5 + $0x274] sm:$0xf]  ;;  %v1430_v52 = vor.u32 %v1841_v40, %v1427_v44  ;;  %v1467_v23 = vld [vmem:[#allocation5 + $0x1a8] sm:$0xf0]  ;;  %v1331_v25 = vld [vmem:[#allocation5 + $0x98] sm:$0xf0]  ;;  %v1406_v28 = vor.u32 %v1835_v17, %v1403_v21 }
  0x4f   :  { %878 = vmatpush.bf16.msrb.mxu1 %v1594_v42  ;;  %v1571_v42 = vld [vmem:[#allocation5 + $0x278] sm:$0xf0]  ;;  %v1853_v9 = vld [vmem:[#allocation5 + $0x1b4] sm:$0xf]  ;;  %v1323_v40 = vld [vmem:[#allocation5 + $0x88] sm:$0xf0] }
  0x50   :  { %891 = vmatpush.bf16.msrb.mxu2 %v1658_v46  ;;  %v1491_v46 = vld [vmem:[#allocation5 + $0x1d8] sm:$0xf0]  ;;  %v1574_v51 = vor.u32 %v1877_v41, %v1571_v42  ;;  %v1833_v30 = vld [vmem:[#allocation5 + $0x114] sm:$0xf]  ;;  %v1831_v41 = vld [vmem:[#allocation5 + $0x104] sm:$0xf] }
  0x51   :  { %903 = vmatpush.bf16.msrb.mxu3 %v1286_v57  ;;  %v1494_v57 = vor.u32 %v1857_v45, %v1491_v46  ;;  %v1869_v31 = vld [vmem:[#allocation5 + $0x234] sm:$0xf]  ;;  %v1459_v37 = vld [vmem:[#allocation5 + $0x198] sm:$0xf0]  ;;  %v1387_v44 = vld [vmem:[#allocation5 + $0x108] sm:$0xf0] }
  0x52   :  { %866 = vmatpush.bf16.msrb.mxu0 %v1522_v58  ;;  %v1419_v58 = vld [vmem:[#allocation5 + $0x148] sm:$0xf0]  ;;  %v1849_v36 = vld [vmem:[#allocation5 + $0x194] sm:$0xf]  ;;  %v1867_v45 = vld [vmem:[#allocation5 + $0x224] sm:$0xf] }
  0x53   :  { %879 = vmatpush.bf16.msrb.mxu1 %v1586_v59  ;;  %v1855_v59 = vld [vmem:[#allocation5 + $0x1c4] sm:$0xf]  ;;  %v1422_v4 = vor.u32 %v1839_v53, %v1419_v58  ;;  %v1531_v46 = vld [vmem:[#allocation5 + $0x228] sm:$0xf0]  ;;  %v1635_v49 = vld [vmem:[#allocation5 + $0x2f8] sm:$0xf0] }
  0x54   :  { %892 = vmatpush.bf16.msrb.mxu2 %v1650_v63  ;;  %v1347_v63 = vld [vmem:[#allocation5 + $0xb8] sm:$0xf0]  ;;  %v1486_v7 = vor.u32 %v1855_v59, %v1483_v60  ;;  %v1909_v50 = vld [vmem:[#allocation5 + $0x374] sm:$0xf]  ;;  %v1451_v53 = vld [vmem:[#allocation5 + $0x188] sm:$0xf0]  ;;  %v1534_v56 = vor.u32 %v1867_v45, %v1531_v46 }
  0x55   :  { %904 = vmatpush.bf16.msrb.mxu3 %v1278_v10  ;;  %v1475_v10 = vld [vmem:[#allocation5 + $0x1b8] sm:$0xf0]  ;;  %v1350_v11 = vor.u32 %v1821_v61, %v1347_v63  ;;  %v1865_v59 = vld [vmem:[#allocation5 + $0x214] sm:$0xf]  ;;  %v1627_v63 = vld [vmem:[#allocation5 + $0x2e8] sm:$0xf0] }
  0x56   :  { %867 = vmatpush.bf16.msrb.mxu0 %v1514_v15  ;;  %v1558_v15 = vor.u32 %v1873_v5, %v1555_v6  ;;  %v1478_v20 = vor.u32 %v1853_v9, %v1475_v10  ;;  %v1523_v60 = vld [vmem:[#allocation5 + $0x218] sm:$0xf0]  ;;  %v1905_v14 = vld [vmem:[#allocation5 + $0x354] sm:$0xf]  ;;  %v1903_v21 = vld [vmem:[#allocation5 + $0x344] sm:$0xf] }
  0x57   :  { %880 = vmatpush.bf16.msrb.mxu1 %v1578_v16  ;;  %v1414_v16 = vor.u32 %v1837_v0, %v1411_v8  ;;  %v1526_v5 = vor.u32 %v1865_v59, %v1523_v60  ;;  %v1515_v8 = vld [vmem:[#allocation5 + $0x208] sm:$0xf0]  ;;  %v1918_v9 = vld [vmem:[#allocation8 + $0x38] sm:$0xff] }
  0x58   :  { %893 = vmatpush.bf16.msrb.mxu2 %v1642_v18  ;;  %v1871_v18 = vld [vmem:[#allocation5 + $0x244] sm:$0xf]  ;;  %v1619_v12 = vld [vmem:[#allocation5 + $0x2d8] sm:$0xf0] }
  0x59   :  { %868 = vmatmul.bf16.vlgmr.msrb.gmra.mxu0 %v2176_v27  ;;  %905 = vmatpush.bf16.msrb.mxu3 %v1270_v33  ;;  %v1539_v33 = vld [vmem:[#allocation5 + $0x238] sm:$0xf0] }
  0x5a   :  { %912 = vmatpush.bf16.msra.mxu0 %v1382_v19  ;;  %881 = vmatmul.bf16.vlgmr.msrb.gmra.mxu1 %v2178_v29  ;;  %v1547_v19 = vld [vmem:[#allocation5 + $0x248] sm:$0xf0]  ;;  %v1542_v42 = vor.u32 %v1869_v31, %v1539_v33  ;;  %v1899_v31 = vld [vmem:[#allocation5 + $0x324] sm:$0xf] }
  0x5b   :  { %925 = vmatpush.bf16.msra.mxu1 %v1446_v22  ;;  %894 = vmatmul.bf16.vlgmr.msrb.gmra.mxu2 %v2180_v32  ;;  %v1851_v22 = vld [vmem:[#allocation5 + $0x1a4] sm:$0xf]  ;;  %v1659_v33 = vld [vmem:[#allocation5 + $0x328] sm:$0xf0] }
  0x5c   :  { %938 = vmatpush.bf16.msra.mxu2 %v1510_v26  ;;  %v1550_v26 = vor.u32 %v1871_v18, %v1547_v19  ;;  %v1470_v34 = vor.u32 %v1851_v22, %v1467_v23  ;;  %v1887_v19 = vld [vmem:[#allocation5 + $0x2c4] sm:$0xf]  ;;  %v1675_v22 = vld [vmem:[#allocation5 + $0x348] sm:$0xf0] }
  0x5d   :  { %906 = vmatpush.bf16.msrb.mxu3 %v1262_v47  ;;  %v1462_v47 = vor.u32 %v1849_v36, %v1459_v37  ;;  %v1678_v23 = vor.u32 %v1903_v21, %v1675_v22  ;;  %v1881_v36 = vld [vmem:[#allocation5 + $0x294] sm:$0xf]  ;;  %v1587_v37 = vld [vmem:[#allocation5 + $0x298] sm:$0xf0] }
  0x5e   :  { %913 = vmatpush.bf16.msra.mxu0 %v1374_v35  ;;  %v1395_v35 = vld [vmem:[#allocation5 + $0x118] sm:$0xf0] }
  0x5f   :  { %926 = vmatpush.bf16.msra.mxu1 %v1438_v39  ;;  %v1815_v39 = vld [vmem:[#allocation5 + $0x84] sm:$0xf]  ;;  %v1922_v21 = vld [vmem:[#allocation8 + $0x58] sm:$0xff] }
  0x60   :  { %939 = vmatpush.bf16.msra.mxu2 %v1502_v43  ;;  %907 = vmatmul.bf16.vlgmr.msrb.gmra.mxu3 %v2167_v1  ;;  %v1817_v1 = vld [vmem:[#allocation5 + $0x94] sm:$0xf]  ;;  %v1398_v43 = vor.u32 %v1833_v30, %v1395_v35  ;;  %v1326_v55 = vor.u32 %v1815_v39, %v1323_v40  ;;  %v1595_v30 = vld [vmem:[#allocation5 + $0x2a8] sm:$0xf0]  ;;  %v1662_v35 = vor.u32 %v1899_v31, %v1659_v33  ;;  %v1651_v39 = vld [vmem:[#allocation5 + $0x318] sm:$0xf0] }
  0x61   :  { %951 = vmatpush.bf16.msra.mxu3 %v1574_v51  ;;  %v1334_v38 = vor.u32 %v1817_v1, %v1331_v25  ;;  %v1699_v51 = vld [vmem:[#allocation5 + $0x378] sm:$0xf0] }
  0x62   :  { %914 = vmatpush.bf16.msra.mxu0 %v1366_v48  ;;  %v1893_v48 = vld [vmem:[#allocation5 + $0x2f4] sm:$0xf]  ;;  %v1702_v61 = vor.u32 %v1909_v50, %v1699_v51  ;;  %v1603_v1 = vld [vmem:[#allocation5 + $0x2b8] sm:$0xf0] }
  0x63   :  { %927 = vmatpush.bf16.msra.mxu1 %v1430_v52  ;;  %v1847_v52 = vld [vmem:[#allocation5 + $0x184] sm:$0xf]  ;;  %v1638_v58 = vor.u32 %v1893_v48, %v1635_v49  ;;  %v1667_v25 = vld [vmem:[#allocation5 + $0x338] sm:$0xf0]  ;;  %v1916_v48 = vld [vmem:[#allocation8 + $0x28] sm:$0xff] }
  0x64   :  { %940 = vmatpush.bf16.msra.mxu2 %v1494_v57  ;;  %v1390_v57 = vor.u32 %v1831_v41, %v1387_v44  ;;  %v1454_v0 = vor.u32 %v1847_v52, %v1451_v53  ;;  %v1879_v41 = vld [vmem:[#allocation5 + $0x284] sm:$0xf]  ;;  %v1643_v44 = vld [vmem:[#allocation5 + $0x308] sm:$0xf0]  ;;  %v1914_v50 = vld [vmem:[#allocation8 + $0x18] sm:$0xff] }
  0x65   :  { %952 = vmatpush.bf16.msra.mxu3 %v1566_v3  ;;  %v1907_v3 = vld [vmem:[#allocation5 + $0x364] sm:$0xf]  ;;  %v1913_v51 = vld [vmem:[#allocation8 + $0x10] sm:$0xff]  ;;  %v1912_v52 = vld [vmem:[#allocation8 + $0x8] sm:$0xff] }
  0x66   :  { %915 = vmatpush.bf16.msra.mxu0 %v1358_v62  ;;  %v1891_v62 = vld [vmem:[#allocation5 + $0x2e4] sm:$0xf] }
  0x67   :  { %928 = vmatpush.bf16.msra.mxu1 %v1422_v4  ;;  %v1691_v4 = vld [vmem:[#allocation5 + $0x368] sm:$0xf0]  ;;  %v1630_v6 = vor.u32 %v1891_v62, %v1627_v63  ;;  %v1915_v49 = vld [vmem:[#allocation8 + $0x20] sm:$0xff] }
  0x68   :  { %941 = vmatpush.bf16.msra.mxu2 %v1486_v7  ;;  %v1863_v7 = vld [vmem:[#allocation5 + $0x204] sm:$0xf]  ;;  %v1694_v10 = vor.u32 %v1907_v3, %v1691_v4 }
  0x69   :  { %953 = vmatpush.bf16.msra.mxu3 %v1558_v15  ;;  %v1683_v15 = vld [vmem:[#allocation5 + $0x358] sm:$0xf0] }
  0x6a   :  { %916 = vmatpush.bf16.msra.mxu0 %v1350_v11  ;;  %v1889_v11 = vld [vmem:[#allocation5 + $0x2d4] sm:$0xf]  ;;  %v1686_v18 = vor.u32 %v1905_v14, %v1683_v15 }
  0x6b   :  { %929 = vmatpush.bf16.msra.mxu1 %v1414_v16  ;;  %v1518_v16 = vor.u32 %v1863_v7, %v1515_v8  ;;  %v1622_v17 = vor.u32 %v1889_v11, %v1619_v12  ;;  %v1926_v7 = vld [vmem:[#allocation8 + $0x78] sm:$0xff]  ;;  %v1924_v11 = vld [vmem:[#allocation8 + $0x68] sm:$0xff] }
  0x6c   :  { %942 = vmatpush.bf16.msra.mxu2 %v1478_v20  ;;  %v1611_v20 = vld [vmem:[#allocation5 + $0x2c8] sm:$0xf0] }
  0x6d   :  { %954 = vmatpush.bf16.msra.mxu3 %v1550_v26 }
  0x6e   :  { %917 = vmatpush.bf16.msra.mxu0 %v1342_v24  ;;  %v1885_v24 = vld [vmem:[#allocation5 + $0x2b4] sm:$0xf] }
  0x6f   :  { %930 = vmatpush.bf16.msra.mxu1 %v1406_v28  ;;  %v1606_v26 = vor.u32 %v1885_v24, %v1603_v1  ;;  %v1883_v28 = vld [vmem:[#allocation5 + $0x2a4] sm:$0xf]  ;;  %v1920_v24 = vld [vmem:[#allocation8 + $0x48] sm:$0xff] }
  0x70   :  { %943 = vmatpush.bf16.msra.mxu2 %v1470_v34  ;;  %v1598_v34 = vor.u32 %v1883_v28, %v1595_v30 }
  0x71   :  { %955 = vmatpush.bf16.msra.mxu3 %v1542_v42  ;;  %v1579_v42 = vld [vmem:[#allocation5 + $0x288] sm:$0xf0] }
  0x72   :  { %918 = vmatpush.bf16.msra.mxu0 %v1334_v38  ;;  %v1897_v38 = vld [vmem:[#allocation5 + $0x314] sm:$0xf]  ;;  %v1582_v45 = vor.u32 %v1879_v41, %v1579_v42 }
  0x73   :  { %931 = vmatpush.bf16.msra.mxu1 %v1398_v43  ;;  %v1654_v40 = vor.u32 %v1897_v38, %v1651_v39  ;;  %v1895_v43 = vld [vmem:[#allocation5 + $0x304] sm:$0xf] }
  0x74   :  { %944 = vmatpush.bf16.msra.mxu2 %v1462_v47  ;;  %v1646_v46 = vor.u32 %v1895_v43, %v1643_v44  ;;  %v1917_v47 = vld [vmem:[#allocation8 + $0x30] sm:$0xff] }
  0x75   :  { %956 = vmatpush.bf16.msra.mxu3 %v1534_v56 }
  0x76   :  { %919 = vmatpush.bf16.msra.mxu0 %v1326_v55 }
  0x77   :  { %932 = vmatpush.bf16.msra.mxu1 %v1390_v57  ;;  %v1911_v57 = vld [vmem:[#allocation8] sm:$0xff] }
  0x78   :  { %945 = vmatpush.bf16.msra.mxu2 %v1454_v0 }
  0x79   :  { %920 = vmatmul.bf16.vlgmr.msra.gmra.mxu0 %v2169_v2  ;;  %957 = vmatpush.bf16.msra.mxu3 %v1526_v5  ;;  %v1614_v2 = vor.u32 %v1887_v19, %v1611_v20  ;;  %v1923_v19 = vld [vmem:[#allocation8 + $0x60] sm:$0xff] }
  0x7a   :  { %964 = vmatpush.bf16.msrb.mxu0 %v1638_v58  ;;  %933 = vmatmul.bf16.vlgmr.msra.gmra.mxu1 %v2164_v54  ;;  %v1901_v54 = vld [vmem:[#allocation5 + $0x334] sm:$0xf]  ;;  %v217_v58 = vld [vmem:[#allocation7] sm:$0x3] }
  0x7b   :  { %977 = vmatpush.bf16.msrb.mxu1 %v1702_v61  ;;  %946 = vmatmul.bf16.vlgmr.msra.gmra.mxu2 %v2172_v13  ;;  %v1670_v13 = vor.u32 %v1901_v54, %v1667_v25  ;;  %v1919_v25 = vld [vmem:[#allocation8 + $0x40] sm:$0xff] }
  0x7c   :  { %1126 = vmatpush.bf16.msrb.mxu2 %v1918_v9  ;;  %v1925_v9 = vld [vmem:[#allocation8 + $0x70] sm:$0xff] }
  0x7d   :  { %958 = vmatpush.bf16.msra.mxu3 %v1518_v16 }
  0x7e   :  { %965 = vmatpush.bf16.msrb.mxu0 %v1630_v6 }
  0x7f   :  { %978 = vmatpush.bf16.msrb.mxu1 %v1694_v10 }
  0x80   :  { %959 = vmatmul.bf16.vlgmr.msra.gmra.mxu3 %v2176_v27  ;;  %v1590_v27 = vor.u32 %v1881_v36, %v1587_v37  ;;  %1127 = vmatpush.bf16.msrb.mxu2 %v1917_v47  ;;  %v1934_v47 = vld [vmem:[#allocation10 + $0x38] sm:$0xff] }
  0x81   :  { %1139 = vmatpush.bf16.msrb.mxu3 %v1926_v7 }
  0x82   :  { %966 = vmatpush.bf16.msrb.mxu0 %v1622_v17 }
  0x83   :  { %979 = vmatpush.bf16.msrb.mxu1 %v1686_v18 }
  0x84   :  { %1128 = vmatpush.bf16.msrb.mxu2 %v1916_v48  ;;  %v1933_v48 = vld [vmem:[#allocation10 + $0x30] sm:$0xff] }
  0x85   :  { %1140 = vmatpush.bf16.msrb.mxu3 %v1925_v9 }
  0x86   :  { %967 = vmatpush.bf16.msrb.mxu0 %v1614_v2  ;;  %v1921_v2 = vld [vmem:[#allocation8 + $0x50] sm:$0xff] }
  0x87   :  { %980 = vmatpush.bf16.msrb.mxu1 %v1678_v23 }
  0x88   :  { %1129 = vmatpush.bf16.msrb.mxu2 %v1915_v49  ;;  %v1932_v49 = vld [vmem:[#allocation10 + $0x28] sm:$0xff] }
  0x89   :  { %1141 = vmatpush.bf16.msrb.mxu3 %v1924_v11 }
  0x8a   :  { %968 = vmatpush.bf16.msrb.mxu0 %v1606_v26  ;;  %v220_v26 = vperm.slane %v217_v58, 1 }
  0x8b   :  { %981 = vmatpush.bf16.msrb.mxu1 %v1670_v13 }
  0x8c   :  { %1130 = vmatpush.bf16.msrb.mxu2 %v1914_v50  ;;  %v1931_v50 = vld [vmem:[#allocation10 + $0x20] sm:$0xff] }
  0x8d   :  { %1142 = vmatpush.bf16.msrb.mxu3 %v1923_v19 }
  0x8e   :  { %969 = vmatpush.bf16.msrb.mxu0 %v1598_v34 }
  0x8f   :  { %982 = vmatpush.bf16.msrb.mxu1 %v1662_v35 }
  0x90   :  { %1131 = vmatpush.bf16.msrb.mxu2 %v1913_v51  ;;  %v1930_v51 = vld [vmem:[#allocation10 + $0x18] sm:$0xff] }
  0x91   :  { %1143 = vmatpush.bf16.msrb.mxu3 %v1922_v21 }
  0x92   :  { %970 = vmatpush.bf16.msrb.mxu0 %v1590_v27 }
  0x93   :  { %983 = vmatpush.bf16.msrb.mxu1 %v1654_v40 }
  0x94   :  { %1132 = vmatpush.bf16.msrb.mxu2 %v1912_v52  ;;  %v1929_v52 = vld [vmem:[#allocation10 + $0x10] sm:$0xff] }
  0x95   :  { %1144 = vmatpush.bf16.msrb.mxu3 %v1921_v2 }
  0x96   :  { %971 = vmatpush.bf16.msrb.mxu0 %v1582_v45 }
  0x97   :  { %984 = vmatpush.bf16.msrb.mxu1 %v1646_v46 }
  0x98   :  { %1133 = vmatpush.bf16.msrb.mxu2 %v1911_v57  ;;  %v1927_v57 = vld [vmem:[#allocation10] sm:$0xff] }
  0x99   :  { %972 = vmatmul.bf16.vlgmr.msrb.gmra.mxu0 %v2178_v29  ;;  %v219_v29 = vperm.slane %v217_v58, 0  ;;  %1145 = vmatpush.bf16.msrb.mxu3 %v1920_v24  ;;  %v1945_v58 = vld [vmem:[%s2205_s4] ss:$0 sm:$0xff] }
  0x9a   :  { %985 = vmatmul.bf16.vlgmr.msrb.gmra.mxu1 %v2180_v32  ;;  %1222 = vmatpush.bf16.msra.mxu0 %v1934_v47 }
  0x9d   :  { %1146 = vmatpush.bf16.msrb.mxu3 %v1919_v25 }
  0x9e   :  { %1223 = vmatpush.bf16.msra.mxu0 %v1933_v48 }
  0xa2   :  { %1224 = vmatpush.bf16.msra.mxu0 %v1932_v49 }
  0xa6   :  { %1225 = vmatpush.bf16.msra.mxu0 %v1931_v50 }
  0xaa   :  { %1226 = vmatpush.bf16.msra.mxu0 %v1930_v51 }
  0xae   :  { %1227 = vmatpush.bf16.msra.mxu0 %v1929_v52 }
  0xb6   :  { %v817_v53 = vpop.f32.mrf.mxu0 }
  0xb7   :  { %v830_v55 = vpop.f32.mrf.mxu1  ;;  %v818_v61 = vadd.f32 %v817_v53, %v219_v29 }
  0xb9   :  { %v831_v63 = vadd.f32 %v830_v55, %v818_v61 }
  0xbe   :  { %v843_v56 = vpop.f32.mrf.mxu2  ;;  %v819_v32 = vpop.f32.mrf.mxu0 }
  0xbf   :  { %v832_v59 = vpop.f32.mrf.mxu1  ;;  %v844_v3 = vadd.f32 %v843_v56, %v831_v63  ;;  %v1928_v56 = vld [vmem:[#allocation10 + $0x8] sm:$0xff]  ;;  %v1946_v63 = vld [vmem:[%s2207_s6] ss:$0 sm:$0xff] }
  0xc0   :  { %1228 = vmatpush.bf16.msra.mxu0 %v1928_v56 }
  0xc3   :  { %v856_v60 = vpop.f32.mrf.mxu3 }
  0xc4   :  { %v857_v4 = vadd.f32 %v856_v60, %v844_v3  ;;  %1229 = vmatpush.bf16.msra.mxu0 %v1927_v57 }
  0xc6   :  { %v845_v62 = vpop.f32.mrf.mxu2 }
  0xcb   :  { %v858_v0 = vpop.f32.mrf.mxu3 }
  0xd6   :  { %v869_v5 = vpop.f32.mrf.mxu0 }
  0xd7   :  { %v882_v6 = vpop.f32.mrf.mxu1  ;;  %v870_v8 = vadd.f32 %v869_v5, %v857_v4 }
  0xd9   :  { %v883_v10 = vadd.f32 %v882_v6, %v870_v8 }
  0xde   :  { %v895_v12 = vpop.f32.mrf.mxu2  ;;  %v871_v15 = vpop.f32.mrf.mxu0 }
  0xdf   :  { %v896_v14 = vadd.f32 %v895_v12, %v883_v10  ;;  %v884_v16 = vpop.f32.mrf.mxu1 }
  0xe1   :  { %v990_v17 = vmax.f32 %v896_v14, 0.0 }
  0xe3   :  { %v992_v18 = vpack.c.bf16 %v990_v17, %v990_v17  ;;  %v908_v20 = vpop.f32.mrf.mxu3 }
  0xe4   :  { %v909_v31 = vadd.f32 %v908_v20, %v220_v26 }
  0xe5   :  { %1134 = vmatmul.bf16.vlgmr.msrb.gmra.mxu2 %v992_v18 }
  0xe6   :  { %v897_v22 = vpop.f32.mrf.mxu2 }
  0xeb   :  { %v910_v23 = vpop.f32.mrf.mxu3 }
  0xf6   :  { %v921_v1 = vpop.f32.mrf.mxu0 }
  0xf7   :  { %v934_v54 = vpop.f32.mrf.mxu1  ;;  %v922_v34 = vadd.f32 %v921_v1, %v909_v31 }
  0xf9   :  { %v935_v36 = vadd.f32 %v934_v54, %v922_v34 }
  0xfe   :  { %v923_v13 = vpop.f32.mrf.mxu0  ;;  %v947_v28 = vpop.f32.mrf.mxu2 }
  0xff   :  { %v936_v30 = vpop.f32.mrf.mxu1  ;;  %v948_v38 = vadd.f32 %v947_v28, %v935_v36 }
 0x103   :  { %v960_v33 = vpop.f32.mrf.mxu3 }
 0x104   :  { %v961_v39 = vadd.f32 %v960_v33, %v948_v38 }
 0x106   :  { %v949_v35 = vpop.f32.mrf.mxu2 }
 0x10b   :  { %v962_v37 = vpop.f32.mrf.mxu3 }
 0x116   :  { %v973_v27 = vpop.f32.mrf.mxu0 }
 0x117   :  { %v974_v40 = vadd.f32 %v973_v27, %v961_v39  ;;  %v986_v41 = vpop.f32.mrf.mxu1 }
 0x119   :  { %v987_v42 = vadd.f32 %v986_v41, %v974_v40 }
 0x11b   :  { %v991_v43 = vmax.f32 %v987_v42, 0.0 }
 0x11d   :  { %v993_v44 = vpack.c.bf16 %v991_v43, %v991_v43 }
 0x11e   :  { %v975_v45 = vpop.f32.mrf.mxu0 }
 0x11f   :  { %v988_v46 = vpop.f32.mrf.mxu1  ;;  %1147 = vmatmul.bf16.vlgmr.msrb.gmra.mxu3 %v993_v44 }
 0x168   :  { %v1135_v53 = vpop.f32.mrf.mxu2 }
 0x169   :  { %v1136_v29 = vadd.f32 %v1945_v58, %v1135_v53 }
 0x170   :  { %v1137_v55 = vpop.f32.mrf.mxu2 }
 0x1a2   :  { %v1148_v32 = vpop.f32.mrf.mxu3 }
 0x1a3   :  { %v1149_v59 = vadd.f32 %v1148_v32, %v1136_v29 }
 0x1a5   :  { %v1152_v60 = vmax.f32 %v1149_v59, 0.0 }
 0x1a7   :  { %v1153_v61 = vpack.c.bf16 %v1152_v60, %v1152_v60 }
 0x1a9   :  { %1230 = vmatmul.bf16.vlgmr.msra.gmra.mxu0 %v1153_v61 }
 0x1aa   :  { %v1150_v62 = vpop.f32.mrf.mxu3 }
 0x226   :  { %v1231_v0 = vpop.f32.mrf.mxu0 }
 0x227   :  { %v1232_v3 = vadd.f32 %v1946_v63, %v1231_v0 }
 0x229   :  { %1235 = vst [vmem:[#allocation11] sm:$0xff] %v1232_v3 }
 0x22a   :  { %1246 = dma.vmem_to_hbm [thread:$0]  %s1242_s30, 128, %s1244_s10, [#allocation4]  }
 0x22e   :  { %v1233_v4 = vpop.f32.mrf.mxu0 }
 0x22f   :  { %2097 = dma.done.wait [#allocation4], 128  }
 0x230   :  { %2098 = vsyncadd [#allocation4], 4294967168 }
 0x231   :  { %1251 = vsyncpa [#allocation3], 1 }
 0x232   :  { %1252 = vsyncpa [#allocation6], 1 }
 0x233   :  { %1253 = vsyncpa [#allocation9], 1 }
 0x234   :  { %1254 = vsyncpa [#allocation4], 1 }

</bundles_post_ra>
